<compile_context>
chip_gen: v5e
topology: v5e:2x2
jax: 0.10.0
libtpu: 0.0.40
codegen_flags: <defaults>
</compile_context>

<pallas_src>
import functools

import jax
import jax.numpy as jnp
from jax.experimental import pallas as pl
from jax.experimental.pallas import tpu as pltpu


def _round_up(x, m):
    return (x + m - 1) // m * m


# ---------------------------------------------------------------------------
# Pallas kernel: correlation matmul + folded running max / argmax over lanes.
# ---------------------------------------------------------------------------
def _match_kernel(a_ref, b_ref, idx_ref, acc_val, acc_idx, *, n_groups):
    r = pl.program_id(2)

    @pl.when(r == 0)
    def _():
        acc_val[...] = jnp.full(acc_val.shape, -jnp.inf, dtype=acc_val.dtype)
        acc_idx[...] = jnp.zeros(acc_idx.shape, dtype=acc_idx.dtype)

    # (p_tile, K) @ (K, r_tile) on the MXU, bf16 inputs, f32 accumulate.
    corr = jnp.dot(a_ref[...], b_ref[...], preferred_element_type=jnp.float32)

    # Fold the r_tile lanes into 128-lane groups with pure VPU compare/select.
    # Slices land on (8,128) tile boundaries => free views, operands stay in
    # vregs; strict '>' keeps the earliest group on exact ties.
    best = corr[:, 0:128]
    best_g = jnp.zeros(best.shape, dtype=jnp.int32)
    for g in range(1, n_groups):
        chunk = corr[:, g * 128:(g + 1) * 128]
        hit = chunk > best
        best = jnp.where(hit, chunk, best)
        best_g = jnp.where(hit, jnp.int32(g), best_g)

    # Single narrow update of the (p_tile, 128) scratch accumulators.
    # Strict '>' keeps the earliest R tile on ties (PyTorch chunked-update order).
    blk = best_g + r * n_groups                       # global 128-lane group id
    better = best > acc_val[...]
    acc_val[...] = jnp.where(better, best, acc_val[...])
    acc_idx[...] = jnp.where(better, blk, acc_idx[...])

    # Deferred cross-lane (XLU) reductions: once per (n, p) block, last R tile.
    # No padded-lane masking needed: padded reference columns are exact copies
    # of column 0, which can never displace the first-occurrence argmax.
    @pl.when(r == pl.num_programs(2) - 1)
    def _():
        av = acc_val[...]                                           # (p_tile, 128)
        row_max = jnp.max(av, axis=1, keepdims=True)                # (p_tile, 1)
        lane = jax.lax.broadcasted_iota(jnp.int32, av.shape, 1)
        col = acc_idx[...] * 128 + lane                             # global ref-patch index
        row_arg = jnp.min(
            jnp.where(av == row_max, col, jnp.int32(2 ** 31 - 1)),
            axis=1, keepdims=True)                                  # first occurrence
        idx_ref[...] = row_arg
        # TODO(synk): lane-dense (1, p_tile) output would remove the masked
        # (p_tile, 1) partial stores; skipped (modest win, risky sublane->lane
        # relayout in the epilogue).


def match_patches(A, B, *, p_tile=1024, r_tile=1024, use_bf16=True):
    """A: (N, P, K) input patches; B: (N, K, R) unit-L2-norm reference patches.
    Returns the first-occurrence argmax reference-patch index, (N, P) int32."""
    N, P, K = A.shape
    _, _, R = B.shape

    # Clamp tiles to the problem size.  VMEM per step at (1024, 1024):
    # corr temp 4 MB + acc 1 MB + out blocks ~1 MB + double-buffered bf16 A/B
    # blocks ~0.3 MB  => ~7 MB; pin the scoped limit to 32 MiB (safe on
    # v5e/v6e/v7x).  NOTE(v7x): keep N * (P_pad // p_tile) >= 2 when tuning
    # p_tile so both TensorCores get parallel work.
    p_tile = min(p_tile, _round_up(P, 8))
    r_tile = min(r_tile, _round_up(R, 128))
    P_pad = _round_up(P, p_tile)
    R_pad = _round_up(R, r_tile)
    # Keep K unpadded in HBM (round to 8 for sublane alignment only): the block
    # covers the full K axis, which satisfies the (8,128) BlockSpec rule, and
    # avoids streaming ~3x padding bytes for small channel counts.
    K_pad = _round_up(K, 8)
    n_groups = r_tile // 128

    # bf16 halves HBM traffic and runs the MXU at native rate; correlation
    # values shift by O(1e-2) worst case which can flip argmax on near-ties.
    dt = jnp.bfloat16 if use_bf16 else jnp.float32
    A_p = jnp.pad(A, ((0, 0), (0, P_pad - P), (0, K_pad - K))).astype(dt)

    # Pad reference columns with copies of column 0 (a *valid* patch): combined
    # with strict-'>' updates and the min-index epilogue, duplicates can never
    # change the returned index, so the kernel needs no lane masking at all.
    B_p = jnp.pad(B, ((0, 0), (0, K_pad - K), (0, 0)))
    if R_pad > R:
        dup = jnp.broadcast_to(B_p[:, :, :1], (N, K_pad, R_pad - R))
        B_p = jnp.concatenate([B_p, dup], axis=2)
    B_p = B_p.astype(dt)

    kern = functools.partial(_match_kernel, n_groups=n_groups)

    idx = pl.pallas_call(
        kern,
        out_shape=jax.ShapeDtypeStruct((N, P_pad, 1), jnp.int32),
        grid_spec=pltpu.PrefetchScalarGridSpec(
            num_scalar_prefetch=0,
            grid=(N, P_pad // p_tile, R_pad // r_tile),
            in_specs=[
                pl.BlockSpec((None, p_tile, K_pad), lambda n, p, r: (n, p, 0)),
                pl.BlockSpec((None, K_pad, r_tile), lambda n, p, r: (n, 0, r)),
            ],
            out_specs=pl.BlockSpec((None, p_tile, 1), lambda n, p, r: (n, p, 0)),
            scratch_shapes=[pltpu.VMEM((p_tile, 128), jnp.float32),
                            pltpu.VMEM((p_tile, 128), jnp.int32)]),
        compiler_params=pltpu.CompilerParams(
            dimension_semantics=("parallel", "parallel", "arbitrary"),
            vmem_limit_bytes=32 * 1024 * 1024),
    )(A_p, B_p)
    return idx[:, :P, 0]


# ---------------------------------------------------------------------------
# JAX glue reproducing the PyTorch module semantics.
# ---------------------------------------------------------------------------
def _extract_patches_pk(feat_nhwc, patch_size):
    """(N, H, W, C) -> (N, P, K); K ordered (tap=(dy,dx), c), P row-major."""
    N, H, W, C = feat_nhwc.shape
    Hp, Wp = H - patch_size + 1, W - patch_size + 1
    taps = [feat_nhwc[:, dy:dy + Hp, dx:dx + Wp, :]
            for dy in range(patch_size) for dx in range(patch_size)]
    a = jnp.stack(taps, axis=3)                               # (N, Hp, Wp, ps*ps, C)
    return a.reshape(N, Hp * Wp, patch_size * patch_size * C)


def _extract_patches_kr(feat_nchw, patch_size):
    """(N, C, H, W) -> (N, K, R); K ordered (tap=(dy,dx), c), R row-major."""
    N, C, H, W = feat_nchw.shape
    Hp, Wp = H - patch_size + 1, W - patch_size + 1
    taps = [feat_nchw[:, :, dy:dy + Hp, dx:dx + Wp]
            for dy in range(patch_size) for dx in range(patch_size)]
    b = jnp.stack(taps, axis=1)                               # (N, ps*ps, C, Hp, Wp)
    return b.reshape(N, patch_size * patch_size * C, Hp * Wp)


def _prepare_patches(feat1, feat2, patch_size):
    """Channel-normalize features, extract im2col patches, and L2-normalize the
    reference patches (PyTorch normalize-then-correlate order, eps as in torch)."""
    def _norm_nchw(f):                                         # F.normalize(dim=0)
        nrm = jnp.sqrt(jnp.sum(f * f, axis=1, keepdims=True))
        return f / jnp.maximum(nrm, 1e-12)

    fi = _norm_nchw(feat1)
    fr = _norm_nchw(feat2)
    # Transpose only the (small) feature map so A is built directly as (N,P,K).
    A = _extract_patches_pk(jnp.transpose(fi, (0, 2, 3, 1)), patch_size)   # (N,P,K)
    B = _extract_patches_kr(fr, patch_size)                                # (N,K,R)
    B = B / (jnp.sqrt(jnp.sum(B * B, axis=1, keepdims=True)) + 1e-5)
    return A, B


def correspondence_generation(feat1, feat2, patch_size=3, stride=1,
                              p_tile=1024, r_tile=1024, use_bf16=True):
    """feat1, feat2: (N, C, H, W) float32 -> (N, 18, H, W) float32."""
    assert stride == 1, "only stride=1 supported (module default)"
    N, C, H, W = feat1.shape
    Hp, Wp = H - patch_size + 1, W - patch_size + 1

    A, B = _prepare_patches(feat1, feat2, patch_size)
    max_idx = match_patches(A, B, p_tile=p_tile, r_tile=r_tile, use_bf16=use_bf16)

    # index -> flow, padded to (H, W)  (== F.pad(flow, (0,0, 0,2, 0,2)) for ps=3)
    idx2 = max_idx.reshape(N, Hp, Wp)
    flow_w = (idx2 % Wp).astype(jnp.float32)
    flow_h = (idx2 // Wp).astype(jnp.float32)
    grid_x = jnp.arange(Wp, dtype=jnp.float32)[None, None, :]
    grid_y = jnp.arange(Hp, dtype=jnp.float32)[None, :, None]
    flow = jnp.stack((flow_w - grid_x, flow_h - grid_y), axis=-1)  # (N, Hp, Wp, 2)
    flow = jnp.pad(flow, ((0, 0), (0, H - Hp), (0, W - Wp), (0, 0)))

    # tensor_shift((i, j)) for i, j in 0..2, zero fill.
    shifted = [jnp.pad(flow, ((0, 0), (i, 0), (j, 0), (0, 0)))[:, :H, :W, :]
               for i in range(3) for j in range(3)]
    offset_list = jnp.stack(shifted, axis=1)                       # (N, 9, H, W, 2)
    # even channels <- flow_h (component 1), odd channels <- flow_w (component 0)
    reorder = jnp.stack([offset_list[..., 1], offset_list[..., 0]], axis=2)
    return reorder.reshape(N, 18, H, W)


if __name__ == "__main__":
    key = jax.random.PRNGKey(0)
    k1, k2 = jax.random.split(key)
    N, C, H, W = 2, 4, 16, 16
    dense_features1 = jax.random.normal(k1, (N, C, H, W), dtype=jnp.float32)
    dense_features2 = jax.random.normal(k2, (N, C, H, W), dtype=jnp.float32)

    fwd = jax.jit(correspondence_generation)
    out = jax.block_until_ready(fwd(dense_features1, dense_features2))
    assert out.shape == (N, 18, H, W), out.shape
    assert bool(jnp.all(jnp.isfinite(out)))

    # Sanity check of the Pallas matching stage against a pure-JAX f32 reference.
    # (bf16 can legitimately flip argmax on near-ties, so compare the f32
    # correlation value at the chosen index instead of the index itself.)
    A, B = _prepare_patches(dense_features1, dense_features2, 3)
    idx = jax.block_until_ready(jax.jit(match_patches)(A, B))
    R = B.shape[-1]
    assert bool(jnp.all((idx >= 0) & (idx < R)))
    corr_ref = jnp.einsum('npk,nkr->npr', A, B)                    # f32 reference
    picked = jnp.take_along_axis(corr_ref, idx[..., None], axis=2)[..., 0]
    assert bool(jnp.all(picked >= corr_ref.max(axis=2) - 5e-2))

    print("KERNEL_OK")
</pallas_src>

<mosaic_0001>
module attributes {stable_mosaic.version = 11 : i64} {
  func.func @_match_kernel(%arg0: i32, %arg1: i32, %arg2: i32, %arg3: memref<1x200x40xbf16, #tpu.memory_space<vmem>>, %arg4: memref<1x40x256xbf16, #tpu.memory_space<vmem>>, %arg5: memref<1x200x1xi32, #tpu.memory_space<vmem>>, %arg6: memref<200x128xf32, #tpu.memory_space<vmem>>, %arg7: memref<200x128xi32, #tpu.memory_space<vmem>>) attributes {dimension_semantics = [#tpu.dimension_semantics<parallel>, #tpu.dimension_semantics<parallel>, #tpu.dimension_semantics<arbitrary>], iteration_bounds = array<i64: 2, 1, 1>, scalar_prefetch = 0 : i64, scratch_operands = 2 : i64, tpu.core_type = #tpu.core_type<tc>, window_params = [{transform_indices = @transform_0, window_bounds = array<i64: 1, 200, 40>}, {transform_indices = @transform_1, window_bounds = array<i64: 1, 40, 256>}, {transform_indices = @transform_2, window_bounds = array<i64: 1, 200, 1>}]} {
    %c0_i32 = arith.constant 0 : i32
    %0 = arith.cmpi eq, %arg2, %c0_i32 : i32
    %1 = arith.extui %0 : i1 to i32
    %c0_i32_0 = arith.constant 0 : i32
    %2 = arith.cmpi ne, %1, %c0_i32_0 : i32
    scf.if %2 {
      %cst_19 = arith.constant 0xFF800000 : f32
      %29 = vector.broadcast %cst_19 : f32 to vector<200x128xf32>
      %c0_20 = arith.constant 0 : index
      %c0_21 = arith.constant 0 : index
      %30 = vector.load %arg6[%c0_20, %c0_21] : memref<200x128xf32, #tpu.memory_space<vmem>>, vector<200x128xf32>
      tpu.vector_store %arg6[%c0_20, %c0_21], %29 {strides = array<i32>} : memref<200x128xf32, #tpu.memory_space<vmem>>, vector<200x128xf32>,
      %c0_i32_22 = arith.constant 0 : i32
      %31 = vector.broadcast %c0_i32_22 : i32 to vector<200x128xi32>
      %c0_23 = arith.constant 0 : index
      %c0_24 = arith.constant 0 : index
      %32 = vector.load %arg7[%c0_23, %c0_24] : memref<200x128xi32, #tpu.memory_space<vmem>>, vector<200x128xi32>
      tpu.vector_store %arg7[%c0_23, %c0_24], %31 {strides = array<i32>} : memref<200x128xi32, #tpu.memory_space<vmem>>, vector<200x128xi32>,
    } else {
    }
    %c0 = arith.constant 0 : index
    %c0_1 = arith.constant 0 : index
    %c0_2 = arith.constant 0 : index
    %3 = vector.load %arg3[%c0, %c0_1, %c0_2] : memref<1x200x40xbf16, #tpu.memory_space<vmem>>, vector<1x200x40xbf16>
    %4 = vector.shape_cast %3 : vector<1x200x40xbf16> to vector<200x40xbf16>
    %c0_3 = arith.constant 0 : index
    %c0_4 = arith.constant 0 : index
    %c0_5 = arith.constant 0 : index
    %5 = vector.load %arg4[%c0_3, %c0_4, %c0_5] : memref<1x40x256xbf16, #tpu.memory_space<vmem>>, vector<1x40x256xbf16>
    %6 = vector.shape_cast %5 : vector<1x40x256xbf16> to vector<40x256xbf16>
    %cst = arith.constant dense<0.000000e+00> : vector<200x256xf32>
    %7 = tpu.matmul %4, %6, %cst {dimension_numbers = #tpu.dot_dimension_numbers<[1], [0], [0], [1], [0, 0, 1, 1], [], []>} : vector<200x40xbf16>, vector<40x256xbf16>, vector<200x256xf32> -> vector<200x256xf32>
    %8 = vector.extract_strided_slice %7 {offsets = [0, 0], sizes = [200, 128], strides = [1, 1]} : vector<200x256xf32> to vector<200x128xf32>
    %c0_i32_6 = arith.constant 0 : i32
    %9 = vector.broadcast %c0_i32_6 : i32 to vector<200x128xi32>
    %10 = vector.extract_strided_slice %7 {offsets = [0, 128], sizes = [200, 128], strides = [1, 1]} : vector<200x256xf32> to vector<200x128xf32>
    %11 = arith.cmpf ogt, %10, %8 : vector<200x128xf32>
    %12 = arith.select %11, %10, %8 : vector<200x128xi1>, vector<200x128xf32>
    %c1_i32 = arith.constant 1 : i32
    %13 = vector.broadcast %c1_i32 : i32 to vector<200x128xi32>
    %14 = arith.select %11, %13, %9 : vector<200x128xi1>, vector<200x128xi32>
    %c2_i32 = arith.constant 2 : i32
    %15 = arith.muli %arg2, %c2_i32 : i32
    %16 = vector.broadcast %15 : i32 to vector<200x128xi32>
    %17 = arith.addi %14, %16 : vector<200x128xi32>
    %c0_7 = arith.constant 0 : index
    %c0_8 = arith.constant 0 : index
    %18 = vector.load %arg6[%c0_7, %c0_8] : memref<200x128xf32, #tpu.memory_space<vmem>>, vector<200x128xf32>
    %19 = arith.cmpf ogt, %12, %18 : vector<200x128xf32>
    %c0_9 = arith.constant 0 : index
    %c0_10 = arith.constant 0 : index
    %20 = vector.load %arg6[%c0_9, %c0_10] : memref<200x128xf32, #tpu.memory_space<vmem>>, vector<200x128xf32>
    %21 = arith.select %19, %12, %20 : vector<200x128xi1>, vector<200x128xf32>
    %c0_11 = arith.constant 0 : index
    %c0_12 = arith.constant 0 : index
    %22 = vector.load %arg6[%c0_11, %c0_12] : memref<200x128xf32, #tpu.memory_space<vmem>>, vector<200x128xf32>
    tpu.vector_store %arg6[%c0_11, %c0_12], %21 {strides = array<i32>} : memref<200x128xf32, #tpu.memory_space<vmem>>, vector<200x128xf32>,
    %c0_13 = arith.constant 0 : index
    %c0_14 = arith.constant 0 : index
    %23 = vector.load %arg7[%c0_13, %c0_14] : memref<200x128xi32, #tpu.memory_space<vmem>>, vector<200x128xi32>
    %24 = arith.select %19, %17, %23 : vector<200x128xi1>, vector<200x128xi32>
    %c0_15 = arith.constant 0 : index
    %c0_16 = arith.constant 0 : index
    %25 = vector.load %arg7[%c0_15, %c0_16] : memref<200x128xi32, #tpu.memory_space<vmem>>, vector<200x128xi32>
    tpu.vector_store %arg7[%c0_15, %c0_16], %24 {strides = array<i32>} : memref<200x128xi32, #tpu.memory_space<vmem>>, vector<200x128xi32>,
    %c0_i32_17 = arith.constant 0 : i32
    %26 = arith.cmpi eq, %arg2, %c0_i32_17 : i32
    %27 = arith.extui %26 : i1 to i32
    %c0_i32_18 = arith.constant 0 : i32
    %28 = arith.cmpi ne, %27, %c0_i32_18 : i32
    scf.if %28 {
      %c0_19 = arith.constant 0 : index
      %c0_20 = arith.constant 0 : index
      %29 = vector.load %arg6[%c0_19, %c0_20] : memref<200x128xf32, #tpu.memory_space<vmem>>, vector<200x128xf32>
      %cst_21 = arith.constant dense<0xFF800000> : vector<200xf32>
      %30 = vector.multi_reduction <maximumf>, %29, %cst_21 [1] : vector<200x128xf32> to vector<200xf32>
      %31 = vector.shape_cast %30 : vector<200xf32> to vector<200x1xf32>
      %32 = tpu.iota {dimensions = array<i32: 1>} : vector<200x128xi32>
      %c0_22 = arith.constant 0 : index
      %c0_23 = arith.constant 0 : index
      %33 = vector.load %arg7[%c0_22, %c0_23] : memref<200x128xi32, #tpu.memory_space<vmem>>, vector<200x128xi32>
      %c128_i32 = arith.constant 128 : i32
      %34 = vector.broadcast %c128_i32 : i32 to vector<200x128xi32>
      %35 = arith.muli %33, %34 : vector<200x128xi32>
      %36 = arith.addi %35, %32 : vector<200x128xi32>
      %37 = vector.broadcast %31 : vector<200x1xf32> to vector<200x128xf32>
      %38 = arith.cmpf oeq, %29, %37 : vector<200x128xf32>
      %c2147483647_i32 = arith.constant 2147483647 : i32
      %39 = vector.broadcast %c2147483647_i32 : i32 to vector<200x128xi32>
      %40 = arith.select %38, %36, %39 : vector<200x128xi1>, vector<200x128xi32>
      %cst_24 = arith.constant dense<2147483647> : vector<200xi32>
      %41 = vector.multi_reduction <minsi>, %40, %cst_24 [1] : vector<200x128xi32> to vector<200xi32>
      %42 = vector.shape_cast %41 : vector<200xi32> to vector<200x1xi32>
      %c0_25 = arith.constant 0 : index
      %c0_26 = arith.constant 0 : index
      %c0_27 = arith.constant 0 : index
      %43 = vector.load %arg5[%c0_25, %c0_26, %c0_27] : memref<1x200x1xi32, #tpu.memory_space<vmem>>, vector<1x200x1xi32>
      %44 = vector.shape_cast %43 : vector<1x200x1xi32> to vector<200x1xi32>
      %45 = vector.shape_cast %42 : vector<200x1xi32> to vector<1x200x1xi32>
      tpu.vector_store %arg5[%c0_25, %c0_26, %c0_27], %45 {strides = array<i32>} : memref<1x200x1xi32, #tpu.memory_space<vmem>>, vector<1x200x1xi32>,
    } else {
    }
    return
  }
  func.func @transform_0(%arg0: i32, %arg1: i32, %arg2: i32) -> (i32, i32, i32) {
    %c0_i32 = arith.constant 0 : i32
    %c0_i32_0 = arith.constant 0 : i32
    return %arg0, %arg1, %c0_i32 : i32, i32, i32
  }
  func.func @transform_1(%arg0: i32, %arg1: i32, %arg2: i32) -> (i32, i32, i32) {
    %c0_i32 = arith.constant 0 : i32
    %c0_i32_0 = arith.constant 0 : i32
    return %arg0, %c0_i32, %arg2 : i32, i32, i32
  }
  func.func @transform_2(%arg0: i32, %arg1: i32, %arg2: i32) -> (i32, i32, i32) {
    %c0_i32 = arith.constant 0 : i32
    %c0_i32_0 = arith.constant 0 : i32
    return %arg0, %arg1, %c0_i32 : i32, i32, i32
  }
}

</mosaic_0001>

<bundles_post_ra>
// kernel: correspondence_generation.1
= control target key start
LH: loop header
LB: loop body
LE: loop exit
PB: predicated region body
PF: predicated region fallthrough
CT: control target
= control target key end

     0   :  { %s1748_s9 = smov 0   ;;  %s1750_s10 = smov 0   ;;  %s2411_s0 = inlined_call_operand.vmem [shape: bf16[2,200,40], index: 0, kind: input, shape index: {}]   ;;  %s2412_s1 = inlined_call_operand.vmem [shape: bf16[2,40,256], index: 1, kind: input, shape index: {}]   ;;  %s2413_s2 = inlined_call_operand.vmem [shape: s32[2,200,1], index: 2, kind: output, shape index: {}]  }
   0x1   :  { %s1752_s11 = smov 0  }
   0x2 LB: > { %s31_s12 = sadd.s32 1, %s1726_s10  ;;  %p1562_p0 = scmp.ge.s32.totalorder %s1730_s11, 1  ;;  %s1730_s11 = sphi %s1752_s11, %s12_s11   ;;  %s1726_s10 = sphi %s1750_s10, %s2415_s10   ;;  %s1722_s9 = sphi %s1748_s9, %s2414_s9  }
   0x3   : > { %p33_p1 = scmp.ge.s32.totalorder %s31_s12, 2  ;;  %p157_p2 = scmp.lt.s32.totalorder %s1730_s11, 3 }
   0x5   : > { %s2417_s12 = smov (%p33_p1, %s31_s12), 0  ;;  %p158_p3 = pnand %p1562_p0, %p157_p2 }
   0x6   : > { %p197_p4 = scmp.lt.s32.totalorder (!%p158_p3), %s1722_s9, 1 }
   0x7   : > { %161 = sbr.rel (%p158_p3) target bundleno = 637 (0x27d), region = 28 }
   0xc   : > { %s2419_s9 = smov (!%p197_p4, %s1722_s9), 1  ;;  %vm439_vm0 = vcmask 1043456   ;;  %vm399_vm1 = vcmask 326656   ;;  %v1732_v36 = vmov 0  }
   0xd   : > { %s1681_s13 = smul.u32 40, %s2419_s9 }
   0xe   : > { %s1680_s17 = smul.u32 100, %s2419_s9 }
   0xf   : > { %s214_s16 = scalar_lea.vmem %s2412_s1, %s1681_s13  ;;  %s1682_s21 = smul.u32 200, %s2419_s9 }
  0x10   : > { %v310_v0 = vld [vmem:[%s214_s16 + $0x20] sm:$0xff]  ;;  %v1624_v5 = vld [vmem:[%s214_s16 + $0x10] sm:$0xf]  ;;  %v1673_v6 = vld [vmem:[%s214_s16 + $0x14] sm:$0xf0]  ;;  %s1776_s20 = scalar_lea.vmem %s2411_s0, %s1680_s17 }
  0x11   : > { %v387_v1 = vunpack.c.l.b16 %v310_v0  ;;  %v388_v2 = vunpack.c.h.b16 %v310_v0  ;;  %v1672_v7 = vld [vmem:[%s214_s16 + $0x14] sm:$0xf]  ;;  %v1626_v8 = vld [vmem:[%s214_s16 + $0x18] sm:$0xf0]  ;;  %v1625_v11 = vor.u32 %v1673_v6, %v1624_v5  ;;  %v1616_v13 = vld [vmem:[%s214_s16] sm:$0xf]  ;;  %s2326_s24 = scalar_lea.vmem %s2413_s2, %s1682_s21 }
  0x12   : > { %v1629_v12 = vor.u32 %v1672_v7, %v1626_v8  ;;  %v1671_v14 = vld [vmem:[%s214_s16 + $0x4] sm:$0xf0]  ;;  %v1670_v15 = vld [vmem:[%s214_s16 + $0x4] sm:$0xf]  ;;  %v1618_v16 = vld [vmem:[%s214_s16 + $0x8] sm:$0xf0] }
  0x13   : > { %v393_v3 = vpack.c.b16 %v387_v1, %v387_v1  ;;  %v394_v4 = vpack.c.b16 %v388_v2, %v388_v2  ;;  %v1617_v17 = vor.u32 %v1671_v14, %v1616_v13  ;;  %v1621_v18 = vor.u32 %v1670_v15, %v1618_v16  ;;  %v1658_v19 = vld [vmem:[%s1776_s20] sm:$0xff]  ;;  %v1665_v20 = vld [vmem:[%s1776_s20 + $0x38] sm:$0xff]  ;;  %v1659_v21 = vld [vmem:[%s1776_s20 + $0x8] sm:$0xff] }
  0x14   : > { %v1666_v22 = vld [vmem:[%s1776_s20 + $0x40] sm:$0xff]  ;;  %v1660_v23 = vld [vmem:[%s1776_s20 + $0x10] sm:$0xff]  ;;  %v1667_v24 = vld [vmem:[%s1776_s20 + $0x48] sm:$0xff] }
  0x15   : > { %v441_v9 = vsel %vm439_vm0, %v393_v3, 0  ;;  %v444_v10 = vsel %vm439_vm0, %v394_v4, 0  ;;  %v1661_v25 = vld [vmem:[%s1776_s20 + $0x18] sm:$0xff]  ;;  %v1668_v26 = vld [vmem:[%s1776_s20 + $0x50] sm:$0xff]  ;;  %v1662_v27 = vld [vmem:[%s1776_s20 + $0x20] sm:$0xff] }
  0x16   : > { %451 = vmatpush.bf16.msra.mxu0 %v441_v9  ;;  %1674 = vmatpush.bf16.msra.mxu2 %v441_v9  ;;  %v1669_v28 = vld [vmem:[%s1776_s20 + $0x58] sm:$0xff]  ;;  %v305_v29 = vld [vmem:[%s1776_s20 + $0x60] sm:$0xf]  ;;  %v1663_v31 = vld [vmem:[%s1776_s20 + $0x28] sm:$0xff] }
  0x17   : > { %524 = vmatpush.bf16.msra.mxu1 %v444_v10  ;;  %1677 = vmatpush.bf16.msra.mxu3 %v444_v10  ;;  %v360_v30 = vunpack.c.l.b16 %v305_v29  ;;  %v1664_v33 = vld [vmem:[%s1776_s20 + $0x30] sm:$0xff] }
  0x19   : > { %v373_v32 = vpack.c.b16 %v360_v30, %v360_v30 }
  0x1a   : > { %452 = vmatpush.bf16.msra.mxu0 %v1625_v11  ;;  %1675 = vmatpush.bf16.msra.mxu2 %v1625_v11 }
  0x1b   : > { %525 = vmatpush.bf16.msra.mxu1 %v1629_v12  ;;  %1678 = vmatpush.bf16.msra.mxu3 %v1629_v12 }
  0x1e   : > { %453 = vmatpush.bf16.msra.mxu0 %v1617_v17  ;;  %1676 = vmatpush.bf16.msra.mxu2 %v1617_v17 }
  0x1f   : > { %526 = vmatpush.bf16.msra.mxu1 %v1621_v18  ;;  %1679 = vmatpush.bf16.msra.mxu3 %v1621_v18 }
  0x21   : > { %1630 = vmatmul.msk.bf16.vlgmr.msra.gmra.mxu0 %vm399_vm1, %v1658_v19  ;;  %1637 = vmatmul.msk.bf16.vlgmr.msra.gmra.mxu2 %vm399_vm1, %v1665_v20 }
  0x22   : > { %1643 = vmatmul.msk.bf16.vlgmr.msra.gmra.mxu1 %vm399_vm1, %v1658_v19  ;;  %1650 = vmatmul.msk.bf16.vlgmr.msra.gmra.mxu3 %vm399_vm1, %v1665_v20 }
  0x31   : > { %1631 = vmatmul.msk.bf16.gmra.mxu0 %vm399_vm1, %v1659_v21  ;;  %1638 = vmatmul.msk.bf16.gmra.mxu2 %vm399_vm1, %v1666_v22 }
  0x32   : > { %1644 = vmatmul.msk.bf16.gmra.mxu1 %vm399_vm1, %v1659_v21  ;;  %1651 = vmatmul.msk.bf16.gmra.mxu3 %vm399_vm1, %v1666_v22 }
  0x41   : > { %1632 = vmatmul.msk.bf16.gmra.mxu0 %vm399_vm1, %v1660_v23  ;;  %1639 = vmatmul.msk.bf16.gmra.mxu2 %vm399_vm1, %v1667_v24 }
  0x42   : > { %1645 = vmatmul.msk.bf16.gmra.mxu1 %vm399_vm1, %v1660_v23  ;;  %1652 = vmatmul.msk.bf16.gmra.mxu3 %vm399_vm1, %v1667_v24 }
  0x51   : > { %1633 = vmatmul.msk.bf16.gmra.mxu0 %vm399_vm1, %v1661_v25  ;;  %1640 = vmatmul.msk.bf16.gmra.mxu2 %vm399_vm1, %v1668_v26 }
  0x52   : > { %1646 = vmatmul.msk.bf16.gmra.mxu1 %vm399_vm1, %v1661_v25  ;;  %1653 = vmatmul.msk.bf16.gmra.mxu3 %vm399_vm1, %v1668_v26 }
  0x61   : > { %1634 = vmatmul.msk.bf16.gmra.mxu0 %vm399_vm1, %v1662_v27  ;;  %1641 = vmatmul.msk.bf16.gmra.mxu2 %vm399_vm1, %v1669_v28 }
  0x62   : > { %1647 = vmatmul.msk.bf16.gmra.mxu1 %vm399_vm1, %v1662_v27  ;;  %1654 = vmatmul.msk.bf16.gmra.mxu3 %vm399_vm1, %v1669_v28 }
  0x71   : > { %1635 = vmatmul.msk.bf16.gmra.mxu0 %vm399_vm1, %v1663_v31  ;;  %1642 = vmatmul.msk.bf16.gmra.mxu2 %vm399_vm1, %v373_v32 }
  0x72   : > { %1648 = vmatmul.msk.bf16.gmra.mxu1 %vm399_vm1, %v1663_v31  ;;  %1655 = vmatmul.msk.bf16.gmra.mxu3 %vm399_vm1, %v373_v32 }
  0x81   : > { %1636 = vmatmul.msk.bf16.gmra.mxu0 %vm399_vm1, %v1664_v33 }
  0x82   : > { %1649 = vmatmul.msk.bf16.gmra.mxu1 %vm399_vm1, %v1664_v33 }
  0x9e   : > { %v455_v34 = vpop.f32.mrf.mxu0 }
  0x9f   : > { %v528_v35 = vpop.f32.mrf.mxu1 }
  0xa0   : > { %vm592_vm2 = vcmp.gt.f32.partialorder %v528_v35, %v455_v34 }
  0xa1   : > { %v642_v37 = vsel %vm592_vm2, 1, %v1732_v36  ;;  %v617_v38 = vsel %vm592_vm2, %v528_v35, %v455_v34 }
  0xa2   : > { %vm719_vm3 = vcmp.gt.f32.partialorder %v617_v38, -inf }
  0xa3   : > { %v1818_v39 = vsel %vm719_vm3, %v617_v38, -inf  ;;  %v1820_v40 = vsel %vm719_vm3, %v642_v37, 0 }
  0xa4   : > { %897 = vmax.xlane.f32.xlu0 %v1818_v39  ;;  %v490_v41 = vpop.f32.mrf.mxu2 }
  0xa5   : > { %v563_v42 = vpop.f32.mrf.mxu3 }
  0xa6   : > { %vm606_vm4 = vcmp.gt.f32.partialorder %v563_v42, %v490_v41  ;;  %v457_v43 = vpop.f32.mrf.mxu0 }
  0xa7   : > { %v656_v44 = vsel %vm606_vm4, 1, %v1732_v36  ;;  %v530_v45 = vpop.f32.mrf.mxu1  ;;  %v631_v46 = vsel %vm606_vm4, %v563_v42, %v490_v41 }
  0xa8   : > { %vm593_vm5 = vcmp.gt.f32.partialorder %v530_v45, %v457_v43  ;;  %vm733_vm6 = vcmp.gt.f32.partialorder %v631_v46, -inf }
  0xa9   : > { %v643_v47 = vsel %vm593_vm5, 1, %v1732_v36  ;;  %v1825_v48 = vsel %vm733_vm6, %v631_v46, -inf  ;;  %v1827_v49 = vsel %vm733_vm6, %v656_v44, 0  ;;  %v618_v50 = vsel %vm593_vm5, %v530_v45, %v457_v43 }
  0xaa   : > { %925 = vmax.xlane.f32.xlu2 %v1825_v48  ;;  %vm720_vm7 = vcmp.gt.f32.partialorder %v618_v50, -inf }
  0xab   : > { %v1830_v51 = vsel %vm720_vm7, %v618_v50, -inf  ;;  %v1832_v52 = vsel %vm720_vm7, %v643_v47, 0 }
  0xac   : > { %899 = vmax.xlane.f32.xlu0 %v1830_v51  ;;  %v492_v53 = vpop.f32.mrf.mxu2 }
  0xad   : > { %v565_v54 = vpop.f32.mrf.mxu3 }
  0xae   : > { %vm607_vm8 = vcmp.gt.f32.partialorder %v565_v54, %v492_v53  ;;  %v460_v55 = vpop.f32.mrf.mxu0 }
  0xaf   : > { %v657_v56 = vsel %vm607_vm8, 1, %v1732_v36  ;;  %v533_v57 = vpop.f32.mrf.mxu1  ;;  %v632_v58 = vsel %vm607_vm8, %v565_v54, %v492_v53 }
  0xb0   : > { %vm594_vm9 = vcmp.gt.f32.partialorder %v533_v57, %v460_v55  ;;  %vm734_vm10 = vcmp.gt.f32.partialorder %v632_v58, -inf }
  0xb1   : > { %v644_v59 = vsel %vm594_vm9, 1, %v1732_v36  ;;  %v1837_v60 = vsel %vm734_vm10, %v657_v56, 0  ;;  %v619_v61 = vsel %vm594_vm9, %v533_v57, %v460_v55  ;;  %v1839_v62 = vsel %vm734_vm10, %v632_v58, -inf }
  0xb2   : > { %vm721_vm11 = vcmp.gt.f32.partialorder %v619_v61, -inf }
  0xb3   : > { %v1841_v63 = vsel %vm721_vm11, %v619_v61, -inf  ;;  %v1843_v0 = vsel %vm721_vm11, %v644_v59, 0 }
  0xb4   : > { %927 = vmax.xlane.f32.xlu0 %v1839_v62  ;;  %901 = vmax.xlane.f32.xlu1 %v1841_v63  ;;  %v495_v1 = vpop.f32.mrf.mxu2 }
  0xb5   : > { %v568_v2 = vpop.f32.mrf.mxu3 }
  0xb6   : > { %vm608_vm12 = vcmp.gt.f32.partialorder %v568_v2, %v495_v1  ;;  %v462_v3 = vpop.f32.mrf.mxu0 }
  0xb7   : > { %v658_v4 = vsel %vm608_vm12, 1, %v1732_v36  ;;  %v535_v5 = vpop.f32.mrf.mxu1  ;;  %v633_v6 = vsel %vm608_vm12, %v568_v2, %v495_v1 }
  0xb8   : > { %vm595_vm13 = vcmp.gt.f32.partialorder %v535_v5, %v462_v3  ;;  %vm735_vm14 = vcmp.gt.f32.partialorder %v633_v6, -inf }
  0xb9   : > { %v645_v7 = vsel %vm595_vm13, 1, %v1732_v36  ;;  %v1849_v8 = vsel %vm735_vm14, %v633_v6, -inf  ;;  %v1851_v9 = vsel %vm735_vm14, %v658_v4, 0  ;;  %v620_v10 = vsel %vm595_vm13, %v535_v5, %v462_v3 }
  0xba   : > { %vm722_vm15 = vcmp.gt.f32.partialorder %v620_v10, -inf }
  0xbb   : > { %v1854_v11 = vsel %vm722_vm15, %v645_v7, 0  ;;  %v1865_v22 = vsel %vm722_vm15, %v620_v10, -inf }
  0xbc   : > { %929 = vmax.xlane.f32.xlu1 %v1849_v8  ;;  %v497_v12 = vpop.f32.mrf.mxu2 }
  0xbd   : > { %v570_v13 = vpop.f32.mrf.mxu3 }
  0xbe   : > { %vm609_vm0 = vcmp.gt.f32.partialorder %v570_v13, %v497_v12  ;;  %v465_v14 = vpop.f32.mrf.mxu0 }
  0xbf   : > { %v659_v15 = vsel %vm609_vm0, 1, %v1732_v36  ;;  %v538_v16 = vpop.f32.mrf.mxu1  ;;  %v634_v17 = vsel %vm609_vm0, %v570_v13, %v497_v12 }
  0xc0   : > { %vm596_vm1 = vcmp.gt.f32.partialorder %v538_v16, %v465_v14  ;;  %vm736_vm2 = vcmp.gt.f32.partialorder %v634_v17, -inf }
  0xc1   : > { %v646_v18 = vsel %vm596_vm1, 1, %v1732_v36  ;;  %v1859_v19 = vsel %vm736_vm2, %v634_v17, -inf  ;;  %v1861_v20 = vsel %vm736_vm2, %v659_v15, 0  ;;  %v621_v21 = vsel %vm596_vm1, %v538_v16, %v465_v14 }
  0xc2   : > { %931 = vmax.xlane.f32.xlu2 %v1859_v19  ;;  %vm723_vm3 = vcmp.gt.f32.partialorder %v621_v21, -inf }
  0xc3   : > { %v1867_v23 = vsel %vm723_vm3, %v646_v18, 0  ;;  %v1871_v30 = vsel %vm723_vm3, %v621_v21, -inf }
  0xc4   : > { %903 = vmax.xlane.f32.xlu1 %v1865_v22  ;;  %v500_v24 = vpop.f32.mrf.mxu2 }
  0xc5   : > { %v573_v25 = vpop.f32.mrf.mxu3 }
  0xc6   : > { %vm610_vm4 = vcmp.gt.f32.partialorder %v573_v25, %v500_v24  ;;  %v467_v26 = vpop.f32.mrf.mxu0 }
  0xc7   : > { %v660_v27 = vsel %vm610_vm4, 1, %v1732_v36  ;;  %v540_v28 = vpop.f32.mrf.mxu1  ;;  %v635_v29 = vsel %vm610_vm4, %v573_v25, %v500_v24 }
  0xc8   : > { %vm597_vm5 = vcmp.gt.f32.partialorder %v540_v28, %v467_v26  ;;  %vm737_vm6 = vcmp.gt.f32.partialorder %v635_v29, -inf }
  0xc9   : > { %v647_v31 = vsel %vm597_vm5, 1, %v1732_v36  ;;  %v1874_v32 = vsel %vm737_vm6, %v635_v29, -inf  ;;  %v1876_v33 = vsel %vm737_vm6, %v660_v27, 0  ;;  %v622_v34 = vsel %vm597_vm5, %v540_v28, %v467_v26 }
  0xca   : > { %933 = vmax.xlane.f32.xlu0 %v1874_v32  ;;  %905 = vmax.xlane.f32.xlu2 %v1871_v30  ;;  %vm724_vm7 = vcmp.gt.f32.partialorder %v622_v34, -inf }
  0xcb   : > { %v1880_v35 = vsel %vm724_vm7, %v647_v31, 0  ;;  %v1883_v45 = vsel %vm724_vm7, %v622_v34, -inf }
  0xcc   : > { %v502_v37 = vpop.f32.mrf.mxu2 }
  0xcd   : > { %v575_v38 = vpop.f32.mrf.mxu3 }
  0xce   : > { %vm611_vm8 = vcmp.gt.f32.partialorder %v575_v38, %v502_v37  ;;  %v470_v41 = vpop.f32.mrf.mxu0 }
  0xcf   : > { %v661_v42 = vsel %vm611_vm8, 1, %v1732_v36  ;;  %v543_v43 = vpop.f32.mrf.mxu1  ;;  %v636_v44 = vsel %vm611_vm8, %v575_v38, %v502_v37 }
  0xd0   : > { %vm598_vm9 = vcmp.gt.f32.partialorder %v543_v43, %v470_v41  ;;  %vm738_vm10 = vcmp.gt.f32.partialorder %v636_v44, -inf }
  0xd1   : > { %v648_v46 = vsel %vm598_vm9, 1, %v1732_v36  ;;  %v1886_v47 = vsel %vm738_vm10, %v636_v44, -inf  ;;  %v1888_v50 = vsel %vm738_vm10, %v661_v42, 0  ;;  %v623_v53 = vsel %vm598_vm9, %v543_v43, %v470_v41 }
  0xd2   : > { %935 = vmax.xlane.f32.xlu1 %v1886_v47  ;;  %907 = vmax.xlane.f32.xlu2 %v1883_v45  ;;  %vm725_vm11 = vcmp.gt.f32.partialorder %v623_v53, -inf }
  0xd3   : > { %v1892_v54 = vsel %vm725_vm11, %v623_v53, -inf  ;;  %v1894_v55 = vsel %vm725_vm11, %v648_v46, 0 }
  0xd4   : > { %909 = vmax.xlane.f32.xlu0 %v1892_v54  ;;  %v505_v56 = vpop.f32.mrf.mxu2 }
  0xd5   : > { %v578_v57 = vpop.f32.mrf.mxu3 }
  0xd6   : > { %vm612_vm12 = vcmp.gt.f32.partialorder %v578_v57, %v505_v56  ;;  %v472_v58 = vpop.f32.mrf.mxu0 }
  0xd7   : > { %v662_v59 = vsel %vm612_vm12, 1, %v1732_v36  ;;  %v545_v61 = vpop.f32.mrf.mxu1  ;;  %v637_v1 = vsel %vm612_vm12, %v578_v57, %v505_v56 }
  0xd8   : > { %vm599_vm13 = vcmp.gt.f32.partialorder %v545_v61, %v472_v58  ;;  %vm739_vm14 = vcmp.gt.f32.partialorder %v637_v1, -inf }
  0xd9   : > { %v649_v2 = vsel %vm599_vm13, 1, %v1732_v36  ;;  %v1899_v3 = vsel %vm739_vm14, %v637_v1, -inf  ;;  %v1901_v4 = vsel %vm739_vm14, %v662_v59, 0  ;;  %v624_v5 = vsel %vm599_vm13, %v545_v61, %v472_v58 }
  0xda   : > { %937 = vmax.xlane.f32.xlu2 %v1899_v3  ;;  %vm726_vm15 = vcmp.gt.f32.partialorder %v624_v5, -inf }
  0xdb   : > { %v1904_v6 = vsel %vm726_vm15, %v624_v5, -inf  ;;  %v1906_v7 = vsel %vm726_vm15, %v649_v2, 0 }
  0xdc   : > { %911 = vmax.xlane.f32.xlu1 %v1904_v6  ;;  %v507_v10 = vpop.f32.mrf.mxu2 }
  0xdd   : > { %v580_v12 = vpop.f32.mrf.mxu3 }
  0xde   : > { %vm613_vm0 = vcmp.gt.f32.partialorder %v580_v12, %v507_v10  ;;  %v475_v13 = vpop.f32.mrf.mxu0 }
  0xdf   : > { %v663_v14 = vsel %vm613_vm0, 1, %v1732_v36  ;;  %v548_v15 = vpop.f32.mrf.mxu1  ;;  %v638_v16 = vsel %vm613_vm0, %v580_v12, %v507_v10 }
  0xe0   : > { %vm600_vm1 = vcmp.gt.f32.partialorder %v548_v15, %v475_v13  ;;  %vm740_vm2 = vcmp.gt.f32.partialorder %v638_v16, -inf }
  0xe1   : > { %v650_v17 = vsel %vm600_vm1, 1, %v1732_v36  ;;  %v1911_v18 = vsel %vm740_vm2, %v638_v16, -inf  ;;  %v1913_v21 = vsel %vm740_vm2, %v663_v14, 0  ;;  %v625_v24 = vsel %vm600_vm1, %v548_v15, %v475_v13 }
  0xe2   : > { %939 = vmax.xlane.f32.xlu0 %v1911_v18  ;;  %vm727_vm3 = vcmp.gt.f32.partialorder %v625_v24, -inf }
  0xe3   : > { %v1916_v25 = vsel %vm727_vm3, %v625_v24, -inf  ;;  %v1918_v26 = vsel %vm727_vm3, %v650_v17, 0 }
  0xe4   : > { %913 = vmax.xlane.f32.xlu2 %v1916_v25  ;;  %v510_v27 = vpop.f32.mrf.mxu2 }
  0xe5   : > { %v583_v28 = vpop.f32.mrf.mxu3 }
  0xe6   : > { %vm614_vm4 = vcmp.gt.f32.partialorder %v583_v28, %v510_v27  ;;  %v477_v29 = vpop.f32.mrf.mxu0 }
  0xe7   : > { %v664_v31 = vsel %vm614_vm4, 1, %v1732_v36  ;;  %v550_v34 = vpop.f32.mrf.mxu1  ;;  %v639_v37 = vsel %vm614_vm4, %v583_v28, %v510_v27 }
  0xe8   : > { %vm601_vm5 = vcmp.gt.f32.partialorder %v550_v34, %v477_v29  ;;  %vm741_vm6 = vcmp.gt.f32.partialorder %v639_v37, -inf }
  0xe9   : > { %v651_v38 = vsel %vm601_vm5, 1, %v1732_v36  ;;  %v1923_v41 = vsel %vm741_vm6, %v639_v37, -inf  ;;  %v1925_v42 = vsel %vm741_vm6, %v664_v31, 0  ;;  %v626_v43 = vsel %vm601_vm5, %v550_v34, %v477_v29 }
  0xea   : > { %941 = vmax.xlane.f32.xlu1 %v1923_v41  ;;  %vm728_vm7 = vcmp.gt.f32.partialorder %v626_v43, -inf }
  0xeb   : > { %v1928_v44 = vsel %vm728_vm7, %v626_v43, -inf  ;;  %v1930_v46 = vsel %vm728_vm7, %v651_v38, 0 }
  0xec   : > { %915 = vmax.xlane.f32.xlu0 %v1928_v44  ;;  %v512_v53 = vpop.f32.mrf.mxu2 }
  0xed   : > { %v585_v56 = vpop.f32.mrf.mxu3 }
  0xee   : > { %vm615_vm8 = vcmp.gt.f32.partialorder %v585_v56, %v512_v53  ;;  %v480_v57 = vpop.f32.mrf.mxu0 }
  0xef   : > { %v665_v58 = vsel %vm615_vm8, 1, %v1732_v36  ;;  %v553_v59 = vpop.f32.mrf.mxu1  ;;  %v640_v61 = vsel %vm615_vm8, %v585_v56, %v512_v53 }
  0xf0   : > { %vm602_vm9 = vcmp.gt.f32.partialorder %v553_v59, %v480_v57  ;;  %vm742_vm10 = vcmp.gt.f32.partialorder %v640_v61, -inf }
  0xf1   : > { %v652_v1 = vsel %vm602_vm9, 1, %v1732_v36  ;;  %v1935_v2 = vsel %vm742_vm10, %v640_v61, -inf  ;;  %v1937_v5 = vsel %vm742_vm10, %v665_v58, 0  ;;  %v627_v10 = vsel %vm602_vm9, %v553_v59, %v480_v57 }
  0xf2   : > { %943 = vmax.xlane.f32.xlu2 %v1935_v2  ;;  %vm729_vm11 = vcmp.gt.f32.partialorder %v627_v10, -inf }
  0xf3   : > { %v1940_v12 = vsel %vm729_vm11, %v627_v10, -inf  ;;  %v1942_v13 = vsel %vm729_vm11, %v652_v1, 0 }
  0xf4   : > { %917 = vmax.xlane.f32.xlu1 %v1940_v12  ;;  %v515_v14 = vpop.f32.mrf.mxu2 }
  0xf5   : > { %v588_v15 = vpop.f32.mrf.mxu3 }
  0xf6   : > { %vm616_vm12 = vcmp.gt.f32.partialorder %v588_v15, %v515_v14  ;;  %v482_v16 = vpop.f32.mrf.mxu0 }
  0xf7   : > { %v666_v17 = vsel %vm616_vm12, 1, %v1732_v36  ;;  %v555_v24 = vpop.f32.mrf.mxu1  ;;  %v641_v27 = vsel %vm616_vm12, %v588_v15, %v515_v14 }
  0xf8   : > { %vm603_vm13 = vcmp.gt.f32.partialorder %v555_v24, %v482_v16  ;;  %vm743_vm14 = vcmp.gt.f32.partialorder %v641_v27, -inf }
  0xf9   : > { %v653_v28 = vsel %vm603_vm13, 1, %v1732_v36  ;;  %v1947_v29 = vsel %vm743_vm14, %v641_v27, -inf  ;;  %v1949_v31 = vsel %vm743_vm14, %v666_v17, 0  ;;  %v628_v34 = vsel %vm603_vm13, %v555_v24, %v482_v16 }
  0xfa   : > { %945 = vmax.xlane.f32.xlu0 %v1947_v29  ;;  %vm730_vm15 = vcmp.gt.f32.partialorder %v628_v34, -inf  ;;  %v947_v27 = vlaneseq }
  0xfb   : > { %v1952_v37 = vsel %vm730_vm15, %v628_v34, -inf  ;;  %v1954_v38 = vsel %vm730_vm15, %v653_v28, 0  ;;  %v974_v28 = vmul.u32 128, %v1820_v40 }
  0xfc   : > { %919 = vmax.xlane.f32.xlu2 %v1952_v37  ;;  %v517_v43 = vpop.f32.mrf.mxu2  ;;  %v1970_v34 = vand.u32 127, %v947_v27 }
  0xfd   : > { %v590_v53 = vpop.f32.mrf.mxu3 }
  0xfe   : > { %v485_v56 = vpop.f32.mrf.mxu0  ;;  %v999_v43 = vadd.s32 %v974_v28, %v1970_v34  ;;  %v989_v28 = vmul.u32 128, %v1837_v60 }
  0xff   : > { %v558_v57 = vpop.f32.mrf.mxu1 }
 0x100   : > { %vm604_vm0 = vcmp.gt.f32.partialorder %v558_v57, %v485_v56 }
 0x101   : > { %v654_v58 = vsel %vm604_vm0, 1, %v1732_v36  ;;  %v629_v59 = vsel %vm604_vm0, %v558_v57, %v485_v56 }
 0x102   : > { %vm731_vm1 = vcmp.gt.f32.partialorder %v629_v59, -inf }
 0x103   : > { %v1958_v61 = vsel %vm731_vm1, %v629_v59, -inf  ;;  %v1960_v1 = vsel %vm731_vm1, %v654_v58, 0  ;;  %v975_v58 = vmul.u32 128, %v1832_v52 }
 0x104   : > { %921 = vmax.xlane.f32.xlu0 %v1958_v61 }
 0x106   : > { %v487_v10 = vpop.f32.mrf.mxu0 }
 0x107   : > { %v560_v14 = vpop.f32.mrf.mxu1 }
 0x108   : > { %vm605_vm2 = vcmp.gt.f32.partialorder %v560_v14, %v487_v10 }
 0x109   : > { %v655_v15 = vsel %vm605_vm2, 1, %v1732_v36  ;;  %v630_v16 = vsel %vm605_vm2, %v560_v14, %v487_v10  ;;  %v988_v36 = vmul.u32 128, %v1827_v49 }
 0x10a   : > { %vm732_vm3 = vcmp.gt.f32.partialorder %v630_v16, -inf }
 0x10b   : > { %v1964_v17 = vsel %vm732_vm3, %v630_v16, -inf  ;;  %v1966_v24 = vsel %vm732_vm3, %v655_v15, 0  ;;  %v1013_v10 = vadd.s32 %v988_v36, %v1970_v34 }
 0x10c   : > { %923 = vmax.xlane.f32.xlu1 %v1964_v17 }
 0x117   : > { %v898_v53 = vpop.xlane.xlu0 %897 }
 0x118   : > { %vm1024_vm4 = vcmp.eq.f32.partialorder %v1818_v39, %v898_v53  ;;  %v1000_v39 = vadd.s32 %v975_v58, %v1970_v34 }
 0x119   : > { %v1975_v56 = vsel %vm1024_vm4, %v999_v43, 2147483647 }
 0x11a   : > { %v1075_v57 = vshra.s32 %v1975_v56, 16 }
 0x11c   : > { %v1979_v59 = vcvt.s32.f32 %v1075_v57 }
 0x11d   : > { %v926_v40 = vpop.xlane.xlu2 %925 }
 0x11e   : > { %vm1038_vm5 = vcmp.eq.f32.partialorder %v1825_v48, %v926_v40  ;;  %1078 = vmin.xlane.f32.xlu1 %v1979_v59  ;;  %v976_v48 = vmul.u32 128, %v1843_v0  ;;  %v990_v40 = vmul.u32 128, %v1851_v9  ;;  %v977_v9 = vmul.u32 128, %v1854_v11 }
 0x11f   : > { %v1984_v14 = vsel %vm1038_vm5, %v1013_v10, 2147483647  ;;  %v900_v49 = vpop.xlane.xlu0 %899  ;;  %v978_v11 = vmul.u32 128, %v1867_v23 }
 0x120   : > { %vm1025_vm6 = vcmp.eq.f32.partialorder %v1830_v51, %v900_v49  ;;  %v1271_v15 = vshra.s32 %v1984_v14, 16  ;;  %v1014_v51 = vadd.s32 %v989_v28, %v1970_v34  ;;  %v1001_v36 = vadd.s32 %v976_v48, %v1970_v34 }
 0x121   : > { %v1989_v16 = vsel %vm1025_vm6, %v1000_v39, 2147483647 }
 0x122   : > { %v1991_v52 = vcvt.s32.f32 %v1271_v15  ;;  %v1089_v27 = vshra.s32 %v1989_v16, 16  ;;  %v991_v15 = vmul.u32 128, %v1861_v20 }
 0x124   : > { %1274 = vmin.xlane.f32.xlu2 %v1991_v52  ;;  %v1997_v43 = vcvt.s32.f32 %v1089_v27 }
 0x126   : > { %1092 = vmin.xlane.f32.xlu0 %v1997_v43 }
 0x127   : > { %v928_v53 = vpop.xlane.xlu0 %927  ;;  %v902_v57 = vpop.xlane.xlu1 %901 }
 0x128   : > { %vm1039_vm7 = vcmp.eq.f32.partialorder %v1839_v62, %v928_v53  ;;  %vm1026_vm8 = vcmp.eq.f32.partialorder %v1841_v63, %v902_v57  ;;  %v1015_v62 = vadd.s32 %v990_v40, %v1970_v34 }
 0x129   : > { %v2004_v58 = vsel %vm1039_vm7, %v1014_v51, 2147483647  ;;  %v2006_v60 = vsel %vm1026_vm8, %v1001_v36, 2147483647  ;;  %v1016_v51 = vadd.s32 %v991_v15, %v1970_v34  ;;  %v1003_v15 = vadd.s32 %v978_v11, %v1970_v34 }
 0x12a   : > { %v1103_v0 = vshra.s32 %v2006_v60, 16  ;;  %v1285_v10 = vshra.s32 %v2004_v58, 16  ;;  %v980_v11 = vmul.u32 128, %v1894_v55 }
 0x12c   : > { %v2011_v39 = vcvt.s32.f32 %v1103_v0  ;;  %v2013_v49 = vcvt.s32.f32 %v1285_v10  ;;  %v1005_v55 = vadd.s32 %v980_v11, %v1970_v34 }
 0x12e   : > { %1106 = vmin.xlane.f32.xlu2 %v2011_v39  ;;  %1288 = vmin.xlane.f32.xlu0 %v2013_v49 }
 0x12f   : > { %v930_v63 = vpop.xlane.xlu1 %929 }
 0x130   : > { %vm1040_vm9 = vcmp.eq.f32.partialorder %v1849_v8, %v930_v63  ;;  %v1002_v8 = vadd.s32 %v977_v9, %v1970_v34  ;;  %v993_v9 = vmul.u32 128, %v1888_v50 }
 0x131   : > { %v2020_v27 = vsel %vm1040_vm9, %v1015_v62, 2147483647  ;;  %v992_v62 = vmul.u32 128, %v1876_v33 }
 0x132   : > { %v1299_v28 = vshra.s32 %v2020_v27, 16 }
 0x133   : > { %v1017_v33 = vadd.s32 %v992_v62, %v1970_v34 }
 0x134   : > { %v2024_v48 = vcvt.s32.f32 %v1299_v28 }
 0x135   : > { %v932_v53 = vpop.xlane.xlu2 %931 }
 0x136   : > { %vm1041_vm10 = vcmp.eq.f32.partialorder %v1859_v19, %v932_v53  ;;  %1302 = vmin.xlane.f32.xlu1 %v2024_v48 }
 0x137   : > { %v2029_v36 = vsel %vm1041_vm10, %v1016_v51, 2147483647  ;;  %v904_v20 = vpop.xlane.xlu1 %903  ;;  %v979_v51 = vmul.u32 128, %v1880_v35 }
 0x138   : > { %vm1027_vm11 = vcmp.eq.f32.partialorder %v1865_v22, %v904_v20  ;;  %v1313_v57 = vshra.s32 %v2029_v36, 16 }
 0x139   : > { %v2035_v0 = vsel %vm1027_vm11, %v1002_v8, 2147483647 }
 0x13a   : > { %v2037_v10 = vcvt.s32.f32 %v1313_v57  ;;  %v1117_v40 = vshra.s32 %v2035_v0, 16  ;;  %v1004_v57 = vadd.s32 %v979_v51, %v1970_v34 }
 0x13c   : > { %1316 = vmin.xlane.f32.xlu2 %v2037_v10  ;;  %v2041_v19 = vcvt.s32.f32 %v1117_v40 }
 0x13d   : > { %v934_v63 = vpop.xlane.xlu0 %933  ;;  %v906_v22 = vpop.xlane.xlu2 %905 }
 0x13e   : > { %vm1028_vm12 = vcmp.eq.f32.partialorder %v1871_v30, %v906_v22  ;;  %1120 = vmin.xlane.f32.xlu1 %v2041_v19  ;;  %vm1042_vm13 = vcmp.eq.f32.partialorder %v1874_v32, %v934_v63  ;;  %v1018_v30 = vadd.s32 %v993_v9, %v1970_v34 }
 0x13f   : > { %v2047_v23 = vsel %vm1028_vm12, %v1003_v15, 2147483647  ;;  %v2056_v8 = vsel %vm1042_vm13, %v1017_v33, 2147483647  ;;  %v994_v15 = vmul.u32 128, %v1901_v4 }
 0x140   : > { %v1131_v28 = vshra.s32 %v2047_v23, 16  ;;  %v1327_v35 = vshra.s32 %v2056_v8, 16 }
 0x142   : > { %v2054_v53 = vcvt.s32.f32 %v1131_v28  ;;  %v981_v28 = vmul.u32 128, %v1906_v7 }
 0x144   : > { %1134 = vmin.xlane.f32.xlu0 %v2054_v53 }
 0x145   : > { %v936_v20 = vpop.xlane.xlu1 %935  ;;  %v908_v32 = vpop.xlane.xlu2 %907 }
 0x146   : > { %vm1043_vm14 = vcmp.eq.f32.partialorder %v1886_v47, %v936_v20  ;;  %vm1029_vm15 = vcmp.eq.f32.partialorder %v1883_v45, %v908_v32  ;;  %v2076_v45 = vcvt.s32.f32 %v1327_v35  ;;  %v995_v32 = vmul.u32 128, %v1913_v21 }
 0x147   : > { %v2065_v50 = vsel %vm1043_vm14, %v1018_v30, 2147483647  ;;  %v2067_v40 = vsel %vm1029_vm15, %v1004_v57, 2147483647  ;;  %v910_v62 = vpop.xlane.xlu0 %909  ;;  %v1006_v30 = vadd.s32 %v981_v28, %v1970_v34 }
 0x148   : > { %v1145_v63 = vshra.s32 %v2067_v40, 16  ;;  %vm1030_vm0 = vcmp.eq.f32.partialorder %v1892_v54, %v910_v62  ;;  %v1341_v22 = vshra.s32 %v2065_v50, 16  ;;  %v1019_v54 = vadd.s32 %v994_v15, %v1970_v34 }
 0x149   : > { %v2081_v51 = vsel %vm1030_vm0, %v1005_v55, 2147483647 }
 0x14a   : > { %v2074_v47 = vcvt.s32.f32 %v1145_v63  ;;  %v2079_v9 = vcvt.s32.f32 %v1341_v22  ;;  %v1159_v20 = vshra.s32 %v2081_v51, 16 }
 0x14c   : > { %1148 = vmin.xlane.f32.xlu2 %v2074_v47  ;;  %1330 = vmin.xlane.f32.xlu0 %v2076_v45  ;;  %v2101_v63 = vcvt.s32.f32 %v1159_v20  ;;  %v983_v20 = vmul.u32 128, %v1930_v46 }
 0x14d   : > { %1344 = vmin.xlane.f32.xlu1 %v2079_v9  ;;  %v938_v4 = vpop.xlane.xlu2 %937 }
 0x14e   : > { %vm1044_vm1 = vcmp.eq.f32.partialorder %v1899_v3, %v938_v4  ;;  %v982_v3 = vmul.u32 128, %v1918_v26  ;;  %v1008_v46 = vadd.s32 %v983_v20, %v1970_v34 }
 0x14f   : > { %v2088_v33 = vsel %vm1044_vm1, %v1019_v54, 2147483647  ;;  %v912_v7 = vpop.xlane.xlu1 %911  ;;  %v996_v54 = vmul.u32 128, %v1925_v42 }
 0x150   : > { %vm1031_vm2 = vcmp.eq.f32.partialorder %v1904_v6, %v912_v7  ;;  %v1355_v57 = vshra.s32 %v2088_v33, 16  ;;  %v1020_v6 = vadd.s32 %v995_v32, %v1970_v34  ;;  %v1007_v55 = vadd.s32 %v982_v3, %v1970_v34 }
 0x151   : > { %v2095_v11 = vsel %vm1031_vm2, %v1006_v30, 2147483647  ;;  %v997_v3 = vmul.u32 128, %v1937_v5 }
 0x152   : > { %v2097_v35 = vcvt.s32.f32 %v1355_v57  ;;  %v1173_v62 = vshra.s32 %v2095_v11, 16  ;;  %v1021_v57 = vadd.s32 %v996_v54, %v1970_v34 }
 0x154   : > { %1358 = vmin.xlane.f32.xlu2 %v2097_v35  ;;  %v2104_v15 = vcvt.s32.f32 %v1173_v62 }
 0x155   : > { %1162 = vmin.xlane.f32.xlu1 %v2101_v63  ;;  %v940_v22 = vpop.xlane.xlu0 %939 }
 0x156   : > { %vm1045_vm3 = vcmp.eq.f32.partialorder %v1911_v18, %v940_v22  ;;  %1176 = vmin.xlane.f32.xlu0 %v2104_v15  ;;  %v984_v22 = vmul.u32 128, %v1942_v13 }
 0x157   : > { %v2110_v21 = vsel %vm1045_vm3, %v1020_v6, 2147483647  ;;  %v914_v26 = vpop.xlane.xlu2 %913 }
 0x158   : > { %vm1032_vm4 = vcmp.eq.f32.partialorder %v1916_v25, %v914_v26  ;;  %v1369_v28 = vshra.s32 %v2110_v21, 16  ;;  %v1009_v5 = vadd.s32 %v984_v22, %v1970_v34 }
 0x159   : > { %v2116_v4 = vsel %vm1032_vm4, %v1007_v55, 2147483647  ;;  %v1022_v55 = vadd.s32 %v997_v3, %v1970_v34 }
 0x15a   : > { %v1187_v30 = vshra.s32 %v2116_v4, 16  ;;  %v2121_v18 = vcvt.s32.f32 %v1369_v28 }
 0x15c   : > { %v2119_v7 = vcvt.s32.f32 %v1187_v30  ;;  %v998_v30 = vmul.u32 128, %v1949_v31 }
 0x15d   : > { %v942_v32 = vpop.xlane.xlu1 %941 }
 0x15e   : > { %vm1046_vm5 = vcmp.eq.f32.partialorder %v1923_v41, %v942_v32  ;;  %1190 = vmin.xlane.f32.xlu2 %v2119_v7  ;;  %1372 = vmin.xlane.f32.xlu0 %v2121_v18 }
 0x15f   : > { %v2128_v25 = vsel %vm1046_vm5, %v1021_v57, 2147483647  ;;  %v916_v42 = vpop.xlane.xlu0 %915 }
 0x160   : > { %vm1033_vm6 = vcmp.eq.f32.partialorder %v1928_v44, %v916_v42  ;;  %v1383_v62 = vshra.s32 %v2128_v25, 16  ;;  %v985_v42 = vmul.u32 128, %v1954_v38 }
 0x161   : > { %v2137_v41 = vsel %vm1033_vm6, %v1008_v46, 2147483647 }
 0x162   : > { %v2134_v6 = vcvt.s32.f32 %v1383_v62  ;;  %v1201_v44 = vshra.s32 %v2137_v41, 16  ;;  %v1010_v46 = vadd.s32 %v985_v42, %v1970_v34 }
 0x164   : > { %1386 = vmin.xlane.f32.xlu1 %v2134_v6  ;;  %v2153_v32 = vcvt.s32.f32 %v1201_v44  ;;  %v986_v44 = vmul.u32 128, %v1960_v1 }
 0x165   : > { %v944_v26 = vpop.xlane.xlu2 %943 }
 0x166   : > { %vm1047_vm7 = vcmp.eq.f32.partialorder %v1935_v2, %v944_v26 }
 0x167   : > { %v2143_v28 = vsel %vm1047_vm7, %v1022_v55, 2147483647  ;;  %v918_v54 = vpop.xlane.xlu1 %917 }
 0x168   : > { %vm1034_vm8 = vcmp.eq.f32.partialorder %v1940_v12, %v918_v54  ;;  %v1397_v13 = vshra.s32 %v2143_v28, 16  ;;  %v1023_v12 = vadd.s32 %v998_v30, %v1970_v34  ;;  %v1011_v54 = vadd.s32 %v986_v44, %v1970_v34 }
 0x169   : > { %v2149_v20 = vsel %vm1034_vm8, %v1009_v5, 2147483647 }
 0x16a   : > { %v2151_v57 = vcvt.s32.f32 %v1397_v13  ;;  %v1215_v2 = vshra.s32 %v2149_v20, 16 }
 0x16c   : > { %1400 = vmin.xlane.f32.xlu2 %v2151_v57  ;;  %1204 = vmin.xlane.f32.xlu1 %v2153_v32  ;;  %v2159_v62 = vcvt.s32.f32 %v1215_v2  ;;  %v987_v2 = vmul.u32 128, %v1966_v24 }
 0x16d   : > { %v946_v3 = vpop.xlane.xlu0 %945 }
 0x16e   : > { %vm1048_vm9 = vcmp.eq.f32.partialorder %v1947_v29, %v946_v3  ;;  %1218 = vmin.xlane.f32.xlu0 %v2159_v62  ;;  %v1012_v42 = vadd.s32 %v987_v2, %v1970_v34  ;;  %v1270_v34 = vand.u32 65535, %v1984_v14 }
 0x16f   : > { %v2164_v31 = vsel %vm1048_vm9, %v1023_v12, 2147483647  ;;  %v920_v22 = vpop.xlane.xlu2 %919 }
 0x170   : > { %vm1035_vm10 = vcmp.eq.f32.partialorder %v1952_v37, %v920_v22  ;;  %v1411_v38 = vshra.s32 %v2164_v31, 16  ;;  %v1074_v22 = vand.u32 65535, %v1975_v56  ;;  %v1272_v44 = vcvt.s32.f32 %v1270_v34 }
 0x171   : > { %v2169_v55 = vsel %vm1035_vm10, %v1010_v46, 2147483647  ;;  %v1088_v56 = vand.u32 65535, %v1989_v16 }
 0x172   : > { %v1229_v26 = vshra.s32 %v2169_v55, 16  ;;  %v2175_v29 = vcvt.s32.f32 %v1411_v38  ;;  %v1076_v38 = vcvt.s32.f32 %v1074_v22 }
 0x173   : > { %v1090_v14 = vcvt.s32.f32 %v1088_v56 }
 0x174   : > { %v2173_v5 = vcvt.s32.f32 %v1229_v26 }
 0x176   : > { %1232 = vmin.xlane.f32.xlu2 %v2173_v5  ;;  %1414 = vmin.xlane.f32.xlu0 %v2175_v29 }
 0x177   : > { %v922_v13 = vpop.xlane.xlu0 %921 }
 0x178   : > { %vm1036_vm11 = vcmp.eq.f32.partialorder %v1958_v61, %v922_v13 }
 0x179   : > { %v2181_v37 = vsel %vm1036_vm11, %v1011_v54, 2147483647 }
 0x17a   : > { %v1243_v30 = vshra.s32 %v2181_v37, 16 }
 0x17c   : > { %v2185_v1 = vcvt.s32.f32 %v1243_v30  ;;  %v1284_v30 = vand.u32 65535, %v2004_v58 }
 0x17e   : > { %1246 = vmin.xlane.f32.xlu0 %v2185_v1 }
 0x17f   : > { %v924_v12 = vpop.xlane.xlu1 %923 }
 0x180   : > { %vm1037_vm12 = vcmp.eq.f32.partialorder %v1964_v17, %v924_v12 }
 0x181   : > { %v2190_v3 = vsel %vm1037_vm12, %v1012_v42, 2147483647 }
 0x182   : > { %v1257_v46 = vshra.s32 %v2190_v3, 16 }
 0x184   : > { %v2193_v61 = vcvt.s32.f32 %v1257_v46  ;;  %v1286_v46 = vcvt.s32.f32 %v1284_v30 }
 0x186   : > { %1260 = vmin.xlane.f32.xlu1 %v2193_v61 }
 0x191   : > { %v2197_v24 = vpop.xlane.xlu1 %1078 }
 0x192   : > { %vm1080_vm13 = vcmp.eq.f32.partialorder %v1979_v59, %v2197_v24  ;;  %v1102_v59 = vand.u32 65535, %v2006_v60 }
 0x193   : > { %v1081_v26 = vsel %vm1080_vm13, %v1076_v38, inf  ;;  %v1312_v38 = vand.u32 65535, %v2029_v36 }
 0x194   : > { %1082 = vmin.xlane.f32.xlu2 %v1081_v26 }
 0x197   : > { %v2202_v17 = vpop.xlane.xlu2 %1274 }
 0x198   : > { %vm1276_vm14 = vcmp.eq.f32.partialorder %v1991_v52, %v2202_v17  ;;  %v1104_v52 = vcvt.s32.f32 %v1102_v59  ;;  %v1144_v59 = vand.u32 65535, %v2067_v40  ;;  %v1354_v40 = vand.u32 65535, %v2088_v33 }
 0x199   : > { %v2206_v54 = vpop.xlane.xlu0 %1092  ;;  %v1277_v13 = vsel %vm1276_vm14, %v1272_v44, inf  ;;  %v1368_v33 = vand.u32 65535, %v2110_v21 }
 0x19a   : > { %1278 = vmin.xlane.f32.xlu1 %v1277_v13  ;;  %vm1094_vm15 = vcmp.eq.f32.partialorder %v1997_v43, %v2206_v54  ;;  %v1298_v43 = vand.u32 65535, %v2020_v27 }
 0x19b   : > { %v1095_v12 = vsel %vm1094_vm15, %v1090_v14, inf }
 0x19c   : > { %v1300_v22 = vcvt.s32.f32 %v1298_v43  ;;  %v1356_v43 = vcvt.s32.f32 %v1354_v40 }
 0x1a1   : > { %v2213_v2 = vpop.xlane.xlu2 %1106  ;;  %v2215_v42 = vpop.xlane.xlu0 %1288 }
 0x1a2   : > { %1096 = vmin.xlane.f32.xlu1 %v1095_v12  ;;  %vm1108_vm0 = vcmp.eq.f32.partialorder %v2011_v39, %v2213_v2  ;;  %vm1290_vm1 = vcmp.eq.f32.partialorder %v2013_v49, %v2215_v42  ;;  %v1116_v39 = vand.u32 65535, %v2035_v0  ;;  %v1314_v49 = vcvt.s32.f32 %v1312_v38 }
 0x1a3   : > { %v1109_v16 = vsel %vm1108_vm0, %v1104_v52, inf  ;;  %v1291_v58 = vsel %vm1290_vm1, %v1286_v46, inf }
 0x1a4   : > { %1110 = vmin.xlane.f32.xlu0 %v1109_v16  ;;  %1292 = vmin.xlane.f32.xlu2 %v1291_v58  ;;  %v1118_v13 = vcvt.s32.f32 %v1116_v39  ;;  %v1158_v16 = vand.u32 65535, %v2081_v51  ;;  %v1172_v51 = vand.u32 65535, %v2095_v11  ;;  %v1186_v39 = vand.u32 65535, %v2116_v4 }
 0x1a5   : > { %v1200_v4 = vand.u32 65535, %v2137_v41  ;;  %v1228_v41 = vand.u32 65535, %v2169_v55 }
 0x1a9   : > { %v2222_v60 = vpop.xlane.xlu1 %1302 }
 0x1aa   : > { %vm1304_vm2 = vcmp.eq.f32.partialorder %v2024_v48, %v2222_v60  ;;  %v1130_v48 = vand.u32 65535, %v2047_v23 }
 0x1ab   : > { %v1305_v34 = vsel %vm1304_vm2, %v1300_v22, inf }
 0x1ac   : > { %1306 = vmin.xlane.f32.xlu0 %v1305_v34  ;;  %v1132_v0 = vcvt.s32.f32 %v1130_v48  ;;  %v1370_v48 = vcvt.s32.f32 %v1368_v33 }
 0x1af   : > { %v2228_v26 = vpop.xlane.xlu2 %1316 }
 0x1b0   : > { %vm1318_vm3 = vcmp.eq.f32.partialorder %v2037_v10, %v2228_v26  ;;  %v1326_v10 = vand.u32 65535, %v2056_v8  ;;  %v1340_v8 = vand.u32 65535, %v2065_v50 }
 0x1b1   : > { %v2232_v44 = vpop.xlane.xlu1 %1120  ;;  %v1319_v27 = vsel %vm1318_vm3, %v1314_v49, inf }
 0x1b2   : > { %1320 = vmin.xlane.f32.xlu1 %v1319_v27  ;;  %vm1122_vm4 = vcmp.eq.f32.partialorder %v2041_v19, %v2232_v44  ;;  %v1146_v19 = vcvt.s32.f32 %v1144_v59  ;;  %v1328_v23 = vcvt.s32.f32 %v1326_v10 }
 0x1b3   : > { %v1123_v36 = vsel %vm1122_vm4, %v1118_v13, inf }
 0x1b4   : > { %1124 = vmin.xlane.f32.xlu2 %v1123_v36  ;;  %v1214_v36 = vand.u32 65535, %v2149_v20 }
 0x1b6   : > { %v1216_v59 = vcvt.s32.f32 %v1214_v36 }
 0x1b7   : > { %v2237_v56 = vpop.xlane.xlu0 %1134 }
 0x1b8   : > { %vm1136_vm5 = vcmp.eq.f32.partialorder %v2054_v53, %v2237_v56 }
 0x1b9   : > { %v1137_v30 = vsel %vm1136_vm5, %v1132_v0, inf }
 0x1ba   : > { %1138 = vmin.xlane.f32.xlu1 %v1137_v30  ;;  %v1202_v30 = vcvt.s32.f32 %v1200_v4 }
 0x1bf   : > { %v2243_v14 = vpop.xlane.xlu2 %1148  ;;  %v2245_v12 = vpop.xlane.xlu0 %1330 }
 0x1c0   : > { %v2247_v52 = vpop.xlane.xlu1 %1344  ;;  %vm1150_vm6 = vcmp.eq.f32.partialorder %v2074_v47, %v2243_v14  ;;  %vm1332_vm7 = vcmp.eq.f32.partialorder %v2076_v45, %v2245_v12  ;;  %v1342_v47 = vcvt.s32.f32 %v1340_v8  ;;  %v1160_v45 = vcvt.s32.f32 %v1158_v16 }
 0x1c1   : > { %v1151_v53 = vsel %vm1150_vm6, %v1146_v19, inf  ;;  %v1333_v46 = vsel %vm1332_vm7, %v1328_v23, inf  ;;  %vm1346_vm8 = vcmp.eq.f32.partialorder %v2079_v9, %v2247_v52  ;;  %v1242_v8 = vand.u32 65535, %v2181_v37 }
 0x1c2   : > { %1152 = vmin.xlane.f32.xlu0 %v1151_v53  ;;  %1334 = vmin.xlane.f32.xlu2 %v1333_v46  ;;  %v1347_v34 = vsel %vm1346_vm8, %v1342_v47, inf  ;;  %v1230_v53 = vcvt.s32.f32 %v1228_v41  ;;  %v1396_v46 = vand.u32 65535, %v2143_v28  ;;  %v1256_v28 = vand.u32 65535, %v2190_v3 }
 0x1c3   : > { %v1244_v40 = vcvt.s32.f32 %v1242_v8  ;;  %vm1424_vm6 = vcmask 7168  }
 0x1c4   : > { %v1398_v55 = vcvt.s32.f32 %v1396_v46  ;;  %v1258_v47 = vcvt.s32.f32 %v1256_v28  ;;  %v1323_v46 = vcvt.f32.s32 %v2228_v26 }
 0x1c7   : > { %v2258_v58 = vpop.xlane.xlu2 %1358 }
 0x1c8   : > { %v2260_v22 = vpop.xlane.xlu1 %1162  ;;  %vm1360_vm9 = vcmp.eq.f32.partialorder %v2097_v35, %v2258_v58  ;;  %v1174_v35 = vcvt.s32.f32 %v1172_v51 }
 0x1c9   : > { %v2264_v38 = vpop.xlane.xlu0 %1176  ;;  %v1361_v50 = vsel %vm1360_vm9, %v1356_v43, inf  ;;  %vm1164_vm10 = vcmp.eq.f32.partialorder %v2101_v63, %v2260_v22  ;;  %v1188_v63 = vcvt.s32.f32 %v1186_v39 }
 0x1ca   : > { %1362 = vmin.xlane.f32.xlu1 %v1361_v50  ;;  %1348 = vmin.xlane.f32.xlu0 %v1347_v34  ;;  %v1165_v9 = vsel %vm1164_vm10, %v1160_v45, inf  ;;  %vm1178_vm11 = vcmp.eq.f32.partialorder %v2104_v15, %v2264_v38  ;;  %v1382_v50 = vand.u32 65535, %v2128_v25  ;;  %v1281_v25 = vcvt.f32.s32 %v2202_v17 }
 0x1cb   : > { %1166 = vmin.xlane.f32.xlu2 %v1165_v9  ;;  %v1179_v13 = vsel %vm1178_vm11, %v1174_v35, inf  ;;  %v1099_v35 = vcvt.f32.s32 %v2206_v54 }
 0x1cd   : > { %v1100_v17 = vshll.u32 %v1099_v35, 16 }
 0x1d1   : > { %v2273_v49 = vpop.xlane.xlu2 %1190  ;;  %v2275_v27 = vpop.xlane.xlu0 %1372 }
 0x1d2   : > { %1180 = vmin.xlane.f32.xlu1 %v1179_v13  ;;  %vm1192_vm12 = vcmp.eq.f32.partialorder %v2119_v7, %v2273_v49  ;;  %vm1374_vm13 = vcmp.eq.f32.partialorder %v2121_v18, %v2275_v27  ;;  %v1113_v13 = vcvt.f32.s32 %v2213_v2  ;;  %v1309_v2 = vcvt.f32.s32 %v2222_v60 }
 0x1d3   : > { %v1193_v11 = vsel %vm1192_vm12, %v1188_v63, inf  ;;  %v1375_v21 = vsel %vm1374_vm13, %v1370_v48, inf  ;;  %v1295_v63 = vcvt.f32.s32 %v2215_v42 }
 0x1d4   : > { %1194 = vmin.xlane.f32.xlu0 %v1193_v11  ;;  %1376 = vmin.xlane.f32.xlu2 %v1375_v21  ;;  %v1114_v21 = vshll.u32 %v1113_v13, 16 }
 0x1d7   : > { %v2281_v15 = vpop.xlane.xlu1 %1386 }
 0x1d8   : > { %vm1388_vm5 = vcmp.eq.f32.partialorder %v2134_v6, %v2281_v15 }
 0x1df   : > { %v2285_v0 = vpop.xlane.xlu1 %1204  ;;  %v2289_v7 = vpop.xlane.xlu2 %1400 }
 0x1e0   : > { %vm1206_vm14 = vcmp.eq.f32.partialorder %v2153_v32, %v2285_v0  ;;  %vm1402_vm1 = vcmp.eq.f32.partialorder %v2151_v57, %v2289_v7 }
 0x1e1   : > { %v2291_v10 = vpop.xlane.xlu0 %1218  ;;  %v1207_v18 = vsel %vm1206_vm14, %v1202_v30, inf  ;;  %v1403_v16 = vsel %vm1402_vm1, %v1398_v55, inf  ;;  %v1296_v30 = vshll.u32 %v1295_v63, 16  ;;  %v1127_v55 = vcvt.f32.s32 %v2232_v44 }
 0x1e2   : > { %1208 = vmin.xlane.f32.xlu2 %v1207_v18  ;;  %vm1220_vm15 = vcmp.eq.f32.partialorder %v2159_v62, %v2291_v10 }
 0x1e3   : > { %v1221_v19 = vsel %vm1220_vm15, %v1216_v59, inf }
 0x1e4   : > { %1222 = vmin.xlane.f32.xlu1 %v1221_v19 }
 0x1e9   : > { %v2296_v20 = vpop.xlane.xlu2 %1232  ;;  %v2298_v23 = vpop.xlane.xlu0 %1414 }
 0x1ea   : > { %vm1234_vm0 = vcmp.eq.f32.partialorder %v2173_v5, %v2296_v20  ;;  %v1410_v5 = vand.u32 65535, %v2164_v31  ;;  %vm1416_vm3 = vcmp.eq.f32.partialorder %v2175_v29, %v2298_v23  ;;  %v1384_v31 = vcvt.s32.f32 %v1382_v50 }
 0x1eb   : > { %v1235_v32 = vsel %vm1234_vm0, %v1230_v53, inf  ;;  %v1085_v29 = vcvt.f32.s32 %v2197_v24  ;;  %v1282_v24 = vshll.u32 %v1281_v25, 16  ;;  %v1310_v53 = vshll.u32 %v1309_v2, 16 }
 0x1ec   : > { %1236 = vmin.xlane.f32.xlu1 %v1235_v32  ;;  %v1412_v37 = vcvt.s32.f32 %v1410_v5  ;;  %v1389_v3 = vsel %vm1388_vm5, %v1384_v31, inf  ;;  %v1128_v5 = vshll.u32 %v1127_v55, 16  ;;  %v1155_v31 = vcvt.f32.s32 %v2243_v14 }
 0x1ed   : > { %v1086_v9 = vshll.u32 %v1085_v29, 16  ;;  %v1169_v14 = vcvt.f32.s32 %v2260_v22  ;;  %v1197_v22 = vcvt.f32.s32 %v2273_v49 }
 0x1f1   : > { %v2306_v62 = vpop.xlane.xlu0 %1246 }
 0x1f2   : > { %vm1248_vm2 = vcmp.eq.f32.partialorder %v2185_v1, %v2306_v62  ;;  %v1417_v1 = vsel %vm1416_vm3, %v1412_v37, inf }
 0x1f3   : > { %v1249_v43 = vsel %vm1248_vm2, %v1244_v40, inf }
 0x1f4   : > { %1404 = vmin.xlane.f32.xlu1 %v1403_v16  ;;  %1250 = vmin.xlane.f32.xlu2 %v1249_v43  ;;  %v1324_v16 = vshll.u32 %v1323_v46, 16 }
 0x1f9   : > { %v2314_v57 = vpop.xlane.xlu1 %1260 }
 0x1fa   : > { %vm1262_vm4 = vcmp.eq.f32.partialorder %v2193_v61, %v2314_v57 }
 0x1fb   : > { %v1263_v45 = vsel %vm1262_vm4, %v1258_v47, inf  ;;  %v1141_v47 = vcvt.f32.s32 %v2237_v56  ;;  %v1156_v56 = vshll.u32 %v1155_v31, 16 }
 0x1fc   : > { %1418 = vmin.xlane.f32.xlu2 %v1417_v1  ;;  %1264 = vmin.xlane.f32.xlu0 %v1263_v45 }
 0x1fd   : > { %v1142_v45 = vshll.u32 %v1141_v47, 16  ;;  %v1239_v47 = vcvt.f32.s32 %v2296_v20 }
 0x204   : > { %1390 = vmin.xlane.f32.xlu0 %v1389_v3  ;;  %v1337_v3 = vcvt.f32.s32 %v2245_v12 }
 0x207   : > { %v1083_v34 = vpop.xlane.xlu2 %1082 }
 0x208   : > { %v1084_v51 = vcvt.f32.s32 %v1083_v34 }
 0x20a   : > { %v1087_v6 = vadd.s32 %v1086_v9, %v1084_v51  ;;  %v1338_v9 = vshll.u32 %v1337_v3, 16 }
 0x20c   : > { %1425 = vst.msk [vmem:[%s2326_s24] sm:$0xff] %vm1424_vm6, %v1087_v6 }
 0x20d   : > { %v1279_v61 = vpop.xlane.xlu1 %1278 }
 0x20e   : > { %v1280_v33 = vcvt.f32.s32 %v1279_v61 }
 0x210   : > { %v1283_v39 = vadd.s32 %v1282_v24, %v1280_v33  ;;  %v1351_v24 = vcvt.f32.s32 %v2247_v52  ;;  %v1365_v33 = vcvt.f32.s32 %v2258_v58 }
 0x212   : > { %1439 = vst.msk [vmem:[%s2326_s24 + $0x70] sm:$0xff] %vm1424_vm6, %v1283_v39  ;;  %v1352_v35 = vshll.u32 %v1351_v24, 16  ;;  %v1366_v13 = vshll.u32 %v1365_v33, 16 }
 0x215   : > { %v1097_v48 = vpop.xlane.xlu1 %1096 }
 0x216   : > { %v1098_v11 = vcvt.f32.s32 %v1097_v48 }
 0x217   : > { %v1111_v4 = vpop.xlane.xlu0 %1110  ;;  %v1293_v36 = vpop.xlane.xlu2 %1292 }
 0x218   : > { %v1101_v18 = vadd.s32 %v1100_v17, %v1098_v11  ;;  %v1112_v59 = vcvt.f32.s32 %v1111_v4  ;;  %v1294_v19 = vcvt.f32.s32 %v1293_v36  ;;  %v1170_v11 = vshll.u32 %v1169_v14, 16 }
 0x219   : > { %v1183_v36 = vcvt.f32.s32 %v2264_v38 }
 0x21a   : > { %1426 = vst.msk [vmem:[%s2326_s24 + $0x8] sm:$0xff] %vm1424_vm6, %v1101_v18  ;;  %v1115_v54 = vadd.s32 %v1114_v21, %v1112_v59  ;;  %v1297_v41 = vadd.s32 %v1296_v30, %v1294_v19  ;;  %v1379_v30 = vcvt.f32.s32 %v2275_v27  ;;  %v1211_v27 = vcvt.f32.s32 %v2285_v0 }
 0x21b   : > { %v1184_v59 = vshll.u32 %v1183_v36, 16 }
 0x21c   : > { %1427 = vst.msk [vmem:[%s2326_s24 + $0x10] sm:$0xff] %vm1424_vm6, %v1115_v54  ;;  %v1198_v54 = vshll.u32 %v1197_v22, 16  ;;  %v1380_v38 = vshll.u32 %v1379_v30, 16 }
 0x21d   : > { %1440 = vst.msk [vmem:[%s2326_s24 + $0x78] sm:$0xff] %vm1424_vm6, %v1297_v41 }
 0x21f   : > { %v1307_v42 = vpop.xlane.xlu0 %1306 }
 0x220   : > { %v1308_v32 = vcvt.f32.s32 %v1307_v42 }
 0x222   : > { %v1311_v8 = vadd.s32 %v1310_v53, %v1308_v32 }
 0x224   : > { %1441 = vst.msk [vmem:[%s2326_s24 + $0x80] sm:$0xff] %vm1424_vm6, %v1311_v8  ;;  %v1225_v8 = vcvt.f32.s32 %v2291_v10 }
 0x225   : > { %v1321_v40 = vpop.xlane.xlu1 %1320 }
 0x226   : > { %v1322_v60 = vcvt.f32.s32 %v1321_v40  ;;  %v1212_v40 = vshll.u32 %v1211_v27, 16 }
 0x227   : > { %v1125_v43 = vpop.xlane.xlu2 %1124 }
 0x228   : > { %v1325_v28 = vadd.s32 %v1324_v16, %v1322_v60  ;;  %v1126_v37 = vcvt.f32.s32 %v1125_v43  ;;  %v1226_v43 = vshll.u32 %v1225_v8, 16 }
 0x22a   : > { %1442 = vst.msk [vmem:[%s2326_s24 + $0x88] sm:$0xff] %vm1424_vm6, %v1325_v28  ;;  %v1129_v1 = vadd.s32 %v1128_v5, %v1126_v37 }
 0x22c   : > { %1428 = vst.msk [vmem:[%s2326_s24 + $0x18] sm:$0xff] %vm1424_vm6, %v1129_v1 }
 0x22d   : > { %v1139_v26 = vpop.xlane.xlu1 %1138 }
 0x22e   : > { %v1140_v44 = vcvt.f32.s32 %v1139_v26  ;;  %v1240_v26 = vshll.u32 %v1239_v47, 16 }
 0x230   : > { %v1143_v50 = vadd.s32 %v1142_v45, %v1140_v44  ;;  %v1407_v45 = vcvt.f32.s32 %v2289_v7  ;;  %v1253_v44 = vcvt.f32.s32 %v2306_v62 }
 0x232   : > { %1429 = vst.msk [vmem:[%s2326_s24 + $0x20] sm:$0xff] %vm1424_vm6, %v1143_v50  ;;  %v1408_v3 = vshll.u32 %v1407_v45, 16 }
 0x235   : > { %v1153_v29 = vpop.xlane.xlu0 %1152  ;;  %v1335_v34 = vpop.xlane.xlu2 %1334 }
 0x236   : > { %v1154_v51 = vcvt.f32.s32 %v1153_v29  ;;  %v1336_v25 = vcvt.f32.s32 %v1335_v34  ;;  %v1254_v29 = vshll.u32 %v1253_v44, 16 }
 0x238   : > { %v1157_v6 = vadd.s32 %v1156_v56, %v1154_v51  ;;  %v1339_v61 = vadd.s32 %v1338_v9, %v1336_v25  ;;  %v1421_v51 = vcvt.f32.s32 %v2298_v23  ;;  %v1267_v25 = vcvt.f32.s32 %v2314_v57 }
 0x23a   : > { %1430 = vst.msk [vmem:[%s2326_s24 + $0x28] sm:$0xff] %vm1424_vm6, %v1157_v6  ;;  %v1422_v6 = vshll.u32 %v1421_v51, 16 }
 0x23b   : > { %1443 = vst.msk [vmem:[%s2326_s24 + $0x90] sm:$0xff] %vm1424_vm6, %v1339_v61  ;;  %v1268_v61 = vshll.u32 %v1267_v25, 16 }
 0x23d   : > { %v1349_v12 = vpop.xlane.xlu0 %1348  ;;  %v1363_v39 = vpop.xlane.xlu1 %1362 }
 0x23e   : > { %v1350_v63 = vcvt.f32.s32 %v1349_v12  ;;  %v1167_v48 = vpop.xlane.xlu2 %1166  ;;  %v1364_v17 = vcvt.f32.s32 %v1363_v39  ;;  %v1393_v39 = vcvt.f32.s32 %v2281_v15 }
 0x23f   : > { %v1168_v52 = vcvt.f32.s32 %v1167_v48 }
 0x240   : > { %v1353_v21 = vadd.s32 %v1352_v35, %v1350_v63  ;;  %v1367_v58 = vadd.s32 %v1366_v13, %v1364_v17  ;;  %v1394_v57 = vshll.u32 %v1393_v39, 16 }
 0x241   : > { %v1171_v4 = vadd.s32 %v1170_v11, %v1168_v52 }
 0x242   : > { %1444 = vst.msk [vmem:[%s2326_s24 + $0x98] sm:$0xff] %vm1424_vm6, %v1353_v21 }
 0x243   : > { %1431 = vst.msk [vmem:[%s2326_s24 + $0x30] sm:$0xff] %vm1424_vm6, %v1171_v4 }
 0x244   : > { %1445 = vst.msk [vmem:[%s2326_s24 + $0xa0] sm:$0xff] %vm1424_vm6, %v1367_v58 }
 0x245   : > { %v1181_v18 = vpop.xlane.xlu1 %1180 }
 0x246   : > { %v1182_v19 = vcvt.f32.s32 %v1181_v18 }
 0x247   : > { %v1195_v41 = vpop.xlane.xlu0 %1194  ;;  %v1377_v2 = vpop.xlane.xlu2 %1376 }
 0x248   : > { %v1185_v42 = vadd.s32 %v1184_v59, %v1182_v19  ;;  %v1196_v53 = vcvt.f32.s32 %v1195_v41  ;;  %v1378_v32 = vcvt.f32.s32 %v1377_v2 }
 0x24a   : > { %1432 = vst.msk [vmem:[%s2326_s24 + $0x38] sm:$0xff] %vm1424_vm6, %v1185_v42  ;;  %v1199_v49 = vadd.s32 %v1198_v54, %v1196_v53  ;;  %v1381_v46 = vadd.s32 %v1380_v38, %v1378_v32 }
 0x24c   : > { %1433 = vst.msk [vmem:[%s2326_s24 + $0x40] sm:$0xff] %vm1424_vm6, %v1199_v49 }
 0x24d   : > { %1446 = vst.msk [vmem:[%s2326_s24 + $0xa8] sm:$0xff] %vm1424_vm6, %v1381_v46 }
 0x255   : > { %v1209_v55 = vpop.xlane.xlu2 %1208 }
 0x256   : > { %v1210_v16 = vcvt.f32.s32 %v1209_v55 }
 0x257   : > { %v1223_v60 = vpop.xlane.xlu1 %1222 }
 0x258   : > { %v1213_v5 = vadd.s32 %v1212_v40, %v1210_v16  ;;  %v1224_v28 = vcvt.f32.s32 %v1223_v60 }
 0x25a   : > { %1434 = vst.msk [vmem:[%s2326_s24 + $0x48] sm:$0xff] %vm1424_vm6, %v1213_v5  ;;  %v1227_v37 = vadd.s32 %v1226_v43, %v1224_v28 }
 0x25c   : > { %1435 = vst.msk [vmem:[%s2326_s24 + $0x50] sm:$0xff] %vm1424_vm6, %v1227_v37 }
 0x25f   : > { %v1237_v1 = vpop.xlane.xlu1 %1236 }
 0x260   : > { %v1238_v0 = vcvt.f32.s32 %v1237_v1 }
 0x262   : > { %v1241_v10 = vadd.s32 %v1240_v26, %v1238_v0 }
 0x264   : > { %1436 = vst.msk [vmem:[%s2326_s24 + $0x58] sm:$0xff] %vm1424_vm6, %v1241_v10 }
 0x267   : > { %v1251_v50 = vpop.xlane.xlu2 %1250  ;;  %v1405_v31 = vpop.xlane.xlu1 %1404 }
 0x268   : > { %v1252_v34 = vcvt.f32.s32 %v1251_v50  ;;  %v1406_v20 = vcvt.f32.s32 %v1405_v31 }
 0x26a   : > { %v1255_v56 = vadd.s32 %v1254_v29, %v1252_v34  ;;  %v1409_v9 = vadd.s32 %v1408_v3, %v1406_v20 }
 0x26c   : > { %1437 = vst.msk [vmem:[%s2326_s24 + $0x60] sm:$0xff] %vm1424_vm6, %v1255_v56 }
 0x26d   : > { %1448 = vst.msk [vmem:[%s2326_s24 + $0xb8] sm:$0xff] %vm1424_vm6, %v1409_v9 }
 0x26f   : > { %v1419_v7 = vpop.xlane.xlu2 %1418  ;;  %v1265_v62 = vpop.xlane.xlu0 %1264 }
 0x270   : > { %v1420_v24 = vcvt.f32.s32 %v1419_v7  ;;  %v1266_v33 = vcvt.f32.s32 %v1265_v62 }
 0x272   : > { %v1423_v14 = vadd.s32 %v1422_v6, %v1420_v24  ;;  %v1269_v12 = vadd.s32 %v1268_v61, %v1266_v33 }
 0x274   : > { %1449 = vst.msk [vmem:[%s2326_s24 + $0xc0] sm:$0xff] %vm1424_vm6, %v1423_v14 }
 0x275   : > { %1438 = vst.msk [vmem:[%s2326_s24 + $0x68] sm:$0xff] %vm1424_vm6, %v1269_v12 }
 0x277   : > { %v1391_v23 = vpop.xlane.xlu0 %1390 }
 0x278   : > { %v1392_v35 = vcvt.f32.s32 %v1391_v23 }
 0x27a   : > { %v1395_v13 = vadd.s32 %v1394_v57, %v1392_v35 }
 0x27c   : > { %1447 = vst.msk [vmem:[%s2326_s24 + $0xb0] sm:$0xff] %vm1424_vm6, %v1395_v13 }
 0x27d PF: > { %s12_s11 = sadd.s32 1, %s1730_s11   ;;  %s2414_s9 = smov %s1726_s10 }
 0x27e   : > { %p9_p5 = scmp.ge.s32.totalorder %s12_s11, 4   ;;  %s2415_s10 = smov %s2417_s12 }
 0x280   :  { %11 = sbr.rel (!%p9_p5) target bundleno = 2 (0x2), region = 69 }

</bundles_post_ra>
